<compile_context>
chip_gen: v6e
topology: v6e:2x2x1
jax: 0.10.0
libtpu: 0.0.40
codegen_flags: <defaults>
</compile_context>

<pallas_src>
import functools

import jax
import jax.numpy as jnp
from jax.experimental import pallas as pl
from jax.experimental.pallas import tpu as pltpu


def _concat3_kernel(a_ref, b_ref, c_ref, o_ref, *, c1, c2):
    """Copy the three channel groups into their slices of the output block."""
    o_ref[:, 0:c1, :] = a_ref[...]
    o_ref[:, c1:c1 + c2, :] = b_ref[...]
    o_ref[:, c1 + c2:, :] = c_ref[...]


def _pick_hw_tile(hw, c_total, itemsize, budget_bytes=16 * 1024 * 1024):
    """Largest multiple-of-128 divisor of `hw` whose double-buffered blocks
    (3 inputs + 1 output ~= 2*c_total rows each, x2 buffers) fit the budget."""
    if hw % 128 != 0:
        # Fall back to the full extent (allowed: block dim == array dim).
        return hw
    # bytes per grid step ~= 2 (dbl-buf) * 2*c_total (in+out rows) * tile * itemsize
    max_tile = max(128, budget_bytes // (4 * c_total * itemsize))
    tile = 128
    while tile * 2 <= min(hw, max_tile) and hw % (tile * 2) == 0:
        tile *= 2
    return tile


def feature_concat3(x, outputs, layers):
    """Pallas equivalent of FeatureConcat3.forward(x, outputs).

    `x` is unused by the original module's forward (kept for API parity).
    """
    del x  # unused, mirrors the PyTorch forward signature
    a = outputs[layers[0]]
    b = outputs[layers[1]]   # .detach() is a no-op for forward values
    c = outputs[layers[2]]   # .detach() is a no-op for forward values

    B, C1, H, W = a.shape
    C2 = b.shape[1]
    C3 = c.shape[1]
    assert b.shape == (B, C2, H, W) and c.shape == (B, C3, H, W)
    assert a.dtype == b.dtype == c.dtype
    HW = H * W
    Ct = C1 + C2 + C3

    # Free metadata reshapes (contiguous trailing dims) -> lane-dense slabs.
    a3 = a.reshape(B, C1, HW)
    b3 = b.reshape(B, C2, HW)
    c3 = c.reshape(B, C3, HW)

    itemsize = jnp.dtype(a.dtype).itemsize
    hw_tile = _pick_hw_tile(HW, Ct, itemsize)
    grid = (B, HW // hw_tile)

    out = pl.pallas_call(
        functools.partial(_concat3_kernel, c1=C1, c2=C2),
        out_shape=jax.ShapeDtypeStruct((B, Ct, HW), a.dtype),
        grid_spec=pltpu.PrefetchScalarGridSpec(
            num_scalar_prefetch=0,
            grid=grid,
            in_specs=[
                pl.BlockSpec((1, C1, hw_tile), lambda bi, hi: (bi, 0, hi)),
                pl.BlockSpec((1, C2, hw_tile), lambda bi, hi: (bi, 0, hi)),
                pl.BlockSpec((1, C3, hw_tile), lambda bi, hi: (bi, 0, hi)),
            ],
            out_specs=pl.BlockSpec((1, Ct, hw_tile), lambda bi, hi: (bi, 0, hi)),
        ),
        compiler_params=pltpu.CompilerParams(
            dimension_semantics=("parallel", "parallel")),
    )(a3, b3, c3)

    return out.reshape(B, Ct, H, W)


if __name__ == "__main__":
    key = jax.random.PRNGKey(0)
    k0, k1, k2, kx = jax.random.split(key, 4)

    # Shapes consistent with the module's use: NCHW feature maps,
    # batch=2, channels=4, spatial=16x16 each.
    B, C, H, W = 2, 4, 16, 16
    outputs = [
        jax.random.normal(k0, (B, C, H, W), dtype=jnp.float32),
        jax.random.normal(k1, (B, C, H, W), dtype=jnp.float32),
        jax.random.normal(k2, (B, C, H, W), dtype=jnp.float32),
    ]
    x_unused = jax.random.normal(kx, (B, C, H, W), dtype=jnp.float32)
    layers = [0, 1, 2]

    out = feature_concat3(x_unused, outputs, layers)
    out = jax.block_until_ready(out)

    ref = jnp.concatenate(
        [outputs[layers[0]], outputs[layers[1]], outputs[layers[2]]], axis=1)
    assert out.shape == (B, 3 * C, H, W), out.shape
    assert out.dtype == ref.dtype
    assert jnp.array_equal(out, ref), "mismatch vs jnp.concatenate reference"
    print("KERNEL_OK")
</pallas_src>

<mosaic_0001>
module attributes {stable_mosaic.version = 11 : i64} {
  func.func @_concat3_kernel(%arg0: i32, %arg1: i32, %arg2: memref<1x4x256xf32, #tpu.memory_space<vmem>>, %arg3: memref<1x4x256xf32, #tpu.memory_space<vmem>>, %arg4: memref<1x4x256xf32, #tpu.memory_space<vmem>>, %arg5: memref<1x12x256xf32, #tpu.memory_space<vmem>>) attributes {dimension_semantics = [#tpu.dimension_semantics<parallel>, #tpu.dimension_semantics<parallel>], iteration_bounds = array<i64: 2, 1>, scalar_prefetch = 0 : i64, scratch_operands = 0 : i64, tpu.core_type = #tpu.core_type<tc>, window_params = [{transform_indices = @transform_0, window_bounds = array<i64: 1, 4, 256>}, {transform_indices = @transform_1, window_bounds = array<i64: 1, 4, 256>}, {transform_indices = @transform_2, window_bounds = array<i64: 1, 4, 256>}, {transform_indices = @transform_3, window_bounds = array<i64: 1, 12, 256>}]} {
    %c0 = arith.constant 0 : index
    %c0_0 = arith.constant 0 : index
    %c0_1 = arith.constant 0 : index
    %0 = vector.load %arg2[%c0, %c0_0, %c0_1] : memref<1x4x256xf32, #tpu.memory_space<vmem>>, vector<1x4x256xf32>
    %c0_2 = arith.constant 0 : index
    %c0_3 = arith.constant 0 : index
    %c0_4 = arith.constant 0 : index
    %1 = vector.load %arg5[%c0_2, %c0_3, %c0_4] : memref<1x12x256xf32, #tpu.memory_space<vmem>>, vector<1x4x256xf32>
    tpu.vector_store %arg5[%c0_2, %c0_3, %c0_4], %0 {strides = array<i32>} : memref<1x12x256xf32, #tpu.memory_space<vmem>>, vector<1x4x256xf32>,
    %c0_5 = arith.constant 0 : index
    %c0_6 = arith.constant 0 : index
    %c0_7 = arith.constant 0 : index
    %2 = vector.load %arg3[%c0_5, %c0_6, %c0_7] : memref<1x4x256xf32, #tpu.memory_space<vmem>>, vector<1x4x256xf32>
    %c0_8 = arith.constant 0 : index
    %c4 = arith.constant 4 : index
    %c0_9 = arith.constant 0 : index
    %3 = vector.load %arg5[%c0_8, %c4, %c0_9] : memref<1x12x256xf32, #tpu.memory_space<vmem>>, vector<1x4x256xf32>
    tpu.vector_store %arg5[%c0_8, %c4, %c0_9], %2 {strides = array<i32>} : memref<1x12x256xf32, #tpu.memory_space<vmem>>, vector<1x4x256xf32>,
    %c0_10 = arith.constant 0 : index
    %c0_11 = arith.constant 0 : index
    %c0_12 = arith.constant 0 : index
    %4 = vector.load %arg4[%c0_10, %c0_11, %c0_12] : memref<1x4x256xf32, #tpu.memory_space<vmem>>, vector<1x4x256xf32>
    %c0_13 = arith.constant 0 : index
    %c8 = arith.constant 8 : index
    %c0_14 = arith.constant 0 : index
    %5 = vector.load %arg5[%c0_13, %c8, %c0_14] : memref<1x12x256xf32, #tpu.memory_space<vmem>>, vector<1x4x256xf32>
    tpu.vector_store %arg5[%c0_13, %c8, %c0_14], %4 {strides = array<i32>} : memref<1x12x256xf32, #tpu.memory_space<vmem>>, vector<1x4x256xf32>,
    return
  }
  func.func @transform_0(%arg0: i32, %arg1: i32) -> (i32, i32, i32) {
    %c0_i32 = arith.constant 0 : i32
    %c0_i32_0 = arith.constant 0 : i32
    return %arg0, %c0_i32, %arg1 : i32, i32, i32
  }
  func.func @transform_1(%arg0: i32, %arg1: i32) -> (i32, i32, i32) {
    %c0_i32 = arith.constant 0 : i32
    %c0_i32_0 = arith.constant 0 : i32
    return %arg0, %c0_i32, %arg1 : i32, i32, i32
  }
  func.func @transform_2(%arg0: i32, %arg1: i32) -> (i32, i32, i32) {
    %c0_i32 = arith.constant 0 : i32
    %c0_i32_0 = arith.constant 0 : i32
    return %arg0, %c0_i32, %arg1 : i32, i32, i32
  }
  func.func @transform_3(%arg0: i32, %arg1: i32) -> (i32, i32, i32) {
    %c0_i32 = arith.constant 0 : i32
    %c0_i32_0 = arith.constant 0 : i32
    return %arg0, %c0_i32, %arg1 : i32, i32, i32
  }
}

</mosaic_0001>

<bundles_post_ra>
// kernel: tpu_custom_call.1
= control target key start
LH: loop header
LB: loop body
LE: loop exit
PB: predicated region body
PF: predicated region fallthrough
CT: control target
= control target key end

     0   :  { %8 = vsyncpa [#allocation3], 0  ;;  %s862_s0 = inlined_call_operand.hbm [shape: f32[2,4,256], index: 0, kind: input, shape index: {}]   ;;  %s863_s1 = inlined_call_operand.hbm [shape: f32[2,4,256], index: 1, kind: input, shape index: {}]   ;;  %s864_s2 = inlined_call_operand.hbm [shape: f32[2,4,256], index: 2, kind: input, shape index: {}]   ;;  %s865_s3 = inlined_call_operand.vmem [shape: f32[2,12,256], index: 3, kind: output, shape index: {}]  }
   0x1   :  { %10 = vsyncpa [#allocation3 + $0x1], 0 }
   0x2   :  { %11 = vsyncpa [#allocation5], 0 }
   0x3   :  { %13 = vsyncpa [#allocation5 + $0x1], 0  ;;  %s718_s12 = smov 0   ;;  %s720_s13 = smov 0  }
   0x4   :  { %s722_s14 = smov 0   ;;  %s724_s15 = smov 0  }
   0x5   :  { %s726_s16 = smov 0   ;;  %s728_s17 = smov 0  }
   0x6 LB: > { %s462_s18 = sadd.s32 4294967295, %s693_s17   ;;  %s31_s19 = sadd.s32 1, %s689_s16  ;;  %s693_s17 = sphi %s728_s17, %s19_s17   ;;  %s689_s16 = sphi %s726_s16, %s873_s16   ;;  %s685_s15 = sphi %s724_s15, %s872_s15   ;;  %s681_s14 = sphi %s722_s14, %s871_s14   ;;  %s677_s13 = sphi %s720_s13, %s870_s13   ;;  %s673_s12 = sphi %s718_s12, %s869_s12  }
   0x7   : > { %p33_p0 = scmp.ge.s32.totalorder %s31_s19, 2  ;;  %s40_s20 = sadd.s32 1, %s681_s14 }
   0x8   : > { %p47_p1 = scmp.ne.s32.totalorder %s681_s14, %s677_s13  ;;  %p48_p2 = scmp.eq.s32.totalorder %s693_s17, 0 }
   0x9   : > { %s875_s19 = smov (%p33_p0, %s31_s19), 0  ;;  %p53_p4 = scmp.ne.s32.totalorder %s677_s13, %s673_s12 }
   0xa   : > { %p49_p3 = por %p48_p2, %p47_p1  ;;  %s35_s21 = ssub.s32 %s689_s16, %s875_s19 }
   0xb   : > { %p54_p5 = scmp.eq.s32.totalorder %s462_s18, 0  ;;  %p38_p6 = scmp.eq.s32.totalorder %s35_s21, 0 }
   0xc   : > { %p503_p8 = scmp.lt.s32.totalorder %s693_s17, 2  ;;  %s161_s24 = sand.u32 1, %s681_s14  }
   0xd   : > { %p759_p7 = por %p54_p5, %p53_p4  ;;  %s769_s25 = sshll.u32 %s689_s16, 7 }
   0xe   : > { %s765_s23 = scalar_select %p38_p6, %s681_s14, %s40_s20  }
   0xf   : > { %s773_s26 = sshll.u32 %s161_s24, 3  ;;  %p775_p9 = pnand %p503_p8, %p49_p3 }
  0x10   : > { %s182_s28 = sand.u32 1, %s693_s17   ;;  %s194_s4 = scalar_lea.hbm %s863_s1, %s769_s25 }
  0x11   : > { %s186_s5 = scalar_lea.vmem [#allocation4], %s773_s26  ;;  %p475_p10 = scmp.ge.s32.totalorder %s693_s17, 1 }
  0x12   : > { %s196_s6 = sshll.u32 %s186_s5, 4  ;;  %s786_s7 = scalar_lea.sflag [#allocation5], %s182_s28  ;;  %s197_s6 = int_to_ptr.vmem [resolvable:$true] %s196_s6 }
  0x13   : > { %p557_p11 = pneg %p775_p9  ;;  %s568_s8 = scalar_lea.vmem %s197_s6, 128 }
  0x14   : > { %p569_p12 = scmp.ne.s32.totalorder %s197_s6, %s568_s8  ;;  %s695_s9 = smov [#allocation4]  }
  0x15   : > { %s573_s10 = sshll.u32 %s695_s9, 4  ;;  %s574_s10 = int_to_ptr.vmem [resolvable:$false] %s573_s10 }
  0x16   : > { %p571_p13 = pnand %p569_p12, %p557_p11  ;;  %s575_s11 = scalar_lea.vmem %s574_s10, 256 }
  0x17   : > { %p576_p1 = scmp.lt.s32.totalorder %s197_s6, %s574_s10  ;;  %p577_p2 = scmp.lt.s32.totalorder %s575_s11, %s568_s8 }
  0x18   : > { %p572_p0 = pneg %p571_p13 }
  0x19   : > { %p578_p3 = por %p577_p2, %p576_p1 }
  0x1b   : > { %p579_p4 = pnand %p578_p3, %p572_p0 }
  0x1d   : > { %582 = shalt.err (!%p579_p4)
}
  0x1e   : > { %499 = dma.hbm_to_vmem [thread:$0]  (!%p775_p9), %s194_s4, 128, %s197_s6, %s786_s7  }
  0x1f   : > { %p222_p5 = scmp.lt.s32.totalorder %s693_s17, 3  ;;  %s173_s28 = scalar_lea.hbm %s862_s0, %s769_s25 }
  0x20   : > { %s165_s29 = scalar_lea.vmem [#allocation2], %s773_s26  ;;  %s162_s5 = scalar_lea.sflag [#allocation3], %s161_s24 }
  0x21   : > { %p799_p6 = pnand %p475_p10, %p222_p5  ;;  %s175_s30 = sshll.u32 %s165_s29, 4  ;;  %s176_s30 = int_to_ptr.vmem [resolvable:$true] %s175_s30 }
  0x22   : > { %s596_s8 = scalar_lea.vmem %s176_s30, 128  ;;  %s696_s4 = smov [#allocation2]  }
  0x23   : > { %p597_p8 = scmp.ne.s32.totalorder %s176_s30, %s596_s8  ;;  %s601_s6 = sshll.u32 %s696_s4, 4  ;;  %s602_s6 = int_to_ptr.vmem [resolvable:$false] %s601_s6 }
  0x24   : > { %s603_s9 = scalar_lea.vmem %s602_s6, 256  ;;  %p604_p10 = scmp.lt.s32.totalorder %s176_s30, %s602_s6 }
  0x25   : > { %p599_p12 = pnand %p597_p8, %p557_p11  ;;  %p605_p0 = scmp.lt.s32.totalorder %s603_s9, %s596_s8 }
  0x27   : > { %p600_p13 = pneg %p599_p12  ;;  %p606_p1 = por %p605_p0, %p604_p10 }
  0x29   : > { %p607_p2 = pnand %p606_p1, %p600_p13 }
  0x2b   : > { %610 = shalt.err (!%p607_p2)
}
  0x2c   : > { %496 = dma.hbm_to_vmem [thread:$0]  (!%p775_p9), %s173_s28, 128, %s176_s30, %s162_s5  }
  0x2d   : > { %s215_s11 = scalar_lea.hbm %s864_s2, %s769_s25  ;;  %s207_s20 = scalar_lea.vmem [#allocation6], %s773_s26 }
  0x2e   : > { %s217_s21 = sshll.u32 %s207_s20, 4  ;;  %s697_s8 = smov [#allocation6]   ;;  %s218_s21 = int_to_ptr.vmem [resolvable:$true] %s217_s21 }
  0x2f   : > { %s624_s29 = scalar_lea.vmem %s218_s21, 128  ;;  %s629_s4 = sshll.u32 %s697_s8, 4  ;;  %s630_s4 = int_to_ptr.vmem [resolvable:$false] %s629_s4 }
  0x30   : > { %p625_p3 = scmp.ne.s32.totalorder %s218_s21, %s624_s29  ;;  %s631_s6 = scalar_lea.vmem %s630_s4, 256 }
  0x31   : > { %p632_p8 = scmp.lt.s32.totalorder %s218_s21, %s630_s4  ;;  %p633_p12 = scmp.lt.s32.totalorder %s631_s6, %s624_s29 }
  0x32   : > { %p627_p4 = pnand %p625_p3, %p557_p11 }
  0x33   : > { %p634_p13 = por %p633_p12, %p632_p8 }
  0x34   : > { %p628_p5 = pneg %p627_p4 }
  0x36   : > { %p635_p10 = pnand %p634_p13, %p628_p5 }
  0x38   : > { %638 = shalt.err (!%p635_p10)
}
  0x39   : > { %502 = dma.hbm_to_vmem [thread:$0]  (!%p775_p9), %s215_s11, 128, %s218_s21, %s786_s7  }
  0x3a   : > { %226 = sbr.rel (%p799_p6) target bundleno = 75 (0x4b), region = 32  ;;  %s228_s25 = sand.u32 (!%p799_p6), 1, %s677_s13  }
  0x3b   : > { %s476_s26 = sshll.u32 (!%p799_p6), %s228_s25, 3  ;;  %s229_s28 = scalar_lea.sflag (!%p799_p6), [#allocation3], %s228_s25 }
  0x3c   : > { %s232_s30 = scalar_lea.vmem (!%p799_p6), [#allocation2], %s476_s26 }
  0x3f   : > { %664 = dma.done.wait (%p759_p7), %s229_s28, 128  }
  0x40   : > { %666 = vsyncadd (%p759_p7), %s229_s28, 4294967168  ;;  %s237_s27 = sand.u32 1, %s462_s18   ;;  %s241_s7 = scalar_lea.vmem [#allocation4], %s476_s26 }
  0x41   : > { %s238_s5 = scalar_lea.sflag [#allocation5], %s237_s27 }
  0x42   : > { %668 = dma.done.wait (%p759_p7), %s238_s5, 256  }
  0x43   : > { %670 = vsyncadd (%p759_p7), %s238_s5, 4294967040  ;;  %p291_p9 = scmp.lt.s32.totalorder %s685_s15, 1  ;;  %v300_v0 = vld [vmem:[%s232_s30] sm:$0xff]  ;;  %v306_v1 = vld [vmem:[%s241_s7] sm:$0xff]  ;;  %s250_s11 = scalar_lea.vmem [#allocation6], %s476_s26 }
  0x44   : > { %v312_v2 = vld [vmem:[%s250_s11] sm:$0xff]  ;;  %v302_v3 = vcombine.high %v300_v0, %v300_v0  ;;  %v308_v4 = vcombine.low %v306_v1, %v306_v1 }
  0x45   : > { %s877_s15 = smov (!%p291_p9, %s685_s15), 1  ;;  %v314_v5 = vcombine.high %v312_v2, %v312_v2 }
  0x46   : > { %s486_s12 = sshll.u32 %s877_s15, 5 }
  0x47   : > { %s298_s10 = scalar_lea.vmem %s865_s3, %s486_s12 }
  0x48   : > { %304 = vst [vmem:[%s298_s10] sm:$0xf] %v300_v0  ;;  %311 = vst [vmem:[%s298_s10 + $0x8] sm:$0xf0] %v306_v1 }
  0x49   : > { %316 = vst [vmem:[%s298_s10 + $0x10] sm:$0xf] %v312_v2  ;;  %305 = vst [vmem:[%s298_s10 + $0x8] sm:$0xf] %v302_v3 }
  0x4a   : > { %310 = vst [vmem:[%s298_s10] sm:$0xf0] %v308_v4  ;;  %317 = vst [vmem:[%s298_s10 + $0x18] sm:$0xf] %v314_v5 }
  0x4b PF: > { %s19_s17 = sadd.s32 1, %s693_s17   ;;  %s869_s12 = smov %s677_s13 }
  0x4c   : > { %p16_p7 = scmp.ge.s32.totalorder %s19_s17, 4   ;;  %s870_s13 = smov %s681_s14 }
  0x4d   : > { %s871_s14 = smov %s765_s23  ;;  %s872_s15 = smov %s689_s16 }
  0x4e   : > { %s873_s16 = smov %s875_s19  ;;  %18 = sbr.rel (!%p16_p7) target bundleno = 6 (0x6), region = 96 }
  0x53   :  { %348 = vsyncpa [#allocation3], 1 }
  0x54   :  { %350 = vsyncpa [#allocation3 + $0x1], 1 }
  0x55   :  { %351 = vsyncpa [#allocation5], 1 }
  0x56   :  { %353 = vsyncpa [#allocation5 + $0x1], 1 }

</bundles_post_ra>
